<compile_context>
chip_gen: v6e
topology: v6e:2x2x1
jax: 0.10.0
libtpu: 0.0.40
codegen_flags: <defaults>
</compile_context>

<pallas_src>
import functools

import jax
import jax.numpy as jnp
from jax import lax
from jax.experimental import pallas as pl
from jax.experimental.pallas import tpu as pltpu

MIN_LOG_STD = -10.0   # unreachable after relu; kept for parity with the PyTorch module
MAX_LOG_STD = 2.0
LANE = 128
H1, H2 = 400, 300     # logical hidden sizes of fc1 / fc2


def _round_up(n, m):
    return (n + m - 1) // m * m


def actor_kernel(action_dim, x_ref, w1_ref, b1_ref, w2_ref, b2_ref,
                 wh_ref, bh_ref, out_ref):
    # fc1 + relu  (bf16 MXU operands, f32 accumulation). x arrives as bf16.
    h1 = jnp.dot(x_ref[...], w1_ref[...],
                 preferred_element_type=jnp.float32) + b1_ref[...]
    h1 = jnp.maximum(h1, 0.0)

    # fc2 + relu
    h2 = jnp.dot(h1.astype(jnp.bfloat16), w2_ref[...],
                 preferred_element_type=jnp.float32) + b2_ref[...]
    h2 = jnp.maximum(h2, 0.0)

    # Fused heads: one lane-dense matmul.
    # Columns [0, A) = mu, [A, 2A) = log_std, remaining columns are zero pad.
    y = jnp.dot(h2.astype(jnp.bfloat16), wh_ref[...],
                preferred_element_type=jnp.float32) + bh_ref[...]

    # log_std columns: relu followed by clamp(-10, 2)  ==  clip(y, 0, 2).
    # Single-row column mask; broadcast along the batch inside the where.
    col = lax.broadcasted_iota(jnp.int32, (1, y.shape[1]), 1)
    is_log_std = (col >= action_dim) & (col < 2 * action_dim)
    y = jnp.where(is_log_std, jnp.clip(y, 0.0, MAX_LOG_STD), y)

    out_ref[...] = y.astype(out_ref.dtype)


def init_params(key, state_dim, action_dim):
    """PyTorch nn.Linear-style init (uniform +/- 1/sqrt(fan_in)), (in, out) layout."""
    def linear(k, fan_in, fan_out):
        kw, kb = jax.random.split(k)
        bound = 1.0 / jnp.sqrt(fan_in)
        w = jax.random.uniform(kw, (fan_in, fan_out), jnp.float32, -bound, bound)
        b = jax.random.uniform(kb, (1, fan_out), jnp.float32, -bound, bound)
        return w, b

    k1, k2, k3, k4 = jax.random.split(key, 4)
    w1, b1 = linear(k1, state_dim, H1)
    w2, b2 = linear(k2, H1, H2)
    wmu, bmu = linear(k3, H2, action_dim)
    wls, bls = linear(k4, H2, action_dim)
    return dict(w1=w1, b1=b1, w2=w2, b2=b2, wmu=wmu, bmu=bmu, wls=wls, bls=bls)


def prepare_params(p, action_dim):
    """Pad hidden dims to lane multiples, fuse the two heads into one lane-dense
    weight, cast weights to bf16 (biases stay f32). Zero padding is exact:
    padded rows/cols contribute nothing to the math."""
    state_dim = p["w1"].shape[0]
    h1p = _round_up(H1, LANE)                            # 512
    h2p = _round_up(H2, LANE)                            # 384
    headp = _round_up(max(2 * action_dim, LANE), LANE)   # 128 for small action dims

    w1 = jnp.zeros((state_dim, h1p), jnp.float32).at[:, :H1].set(p["w1"])
    b1 = jnp.zeros((1, h1p), jnp.float32).at[:, :H1].set(p["b1"])
    w2 = jnp.zeros((h1p, h2p), jnp.float32).at[:H1, :H2].set(p["w2"])
    b2 = jnp.zeros((1, h2p), jnp.float32).at[:, :H2].set(p["b2"])

    wh = (jnp.zeros((h2p, headp), jnp.float32)
          .at[:H2, :action_dim].set(p["wmu"])
          .at[:H2, action_dim:2 * action_dim].set(p["wls"]))
    bh = (jnp.zeros((1, headp), jnp.float32)
          .at[:, :action_dim].set(p["bmu"])
          .at[:, action_dim:2 * action_dim].set(p["bls"]))

    return dict(w1=w1.astype(jnp.bfloat16), b1=b1,
                w2=w2.astype(jnp.bfloat16), b2=b2,
                wh=wh.astype(jnp.bfloat16), bh=bh,
                action_dim=action_dim, headp=headp)


def actor_forward(x, pp):
    """x: (B, state_dim). pp: output of prepare_params. Returns (mu, log_std) f32."""
    B, state_dim = x.shape
    A = pp["action_dim"]
    headp = pp["headp"]

    # Single bf16 cast in the wrapper (no-op if observations are already bf16);
    # halves the x DMA into the kernel.
    x = x.astype(jnp.bfloat16)

    # Batch tiling:
    #  * B <= 256: one step, weights resident, whole batch.
    #  * otherwise: >= 2 steps so the "parallel" axis spans both v7x TCs,
    #    even step count for balance, TB capped at 1024 rows/step
    #    (VMEM-safe on v5e's 16 MiB scoped default).
    # No batch padding: grid = cdiv(B, TB); Pallas masks the partial tail block.
    if B <= 256:
        TB = B
    else:
        n_steps = _round_up(max(2, pl.cdiv(B, 1024)), 2)
        TB = _round_up(pl.cdiv(B, n_steps), 8)
    grid = (pl.cdiv(B, TB),)

    w1, b1 = pp["w1"], pp["b1"]
    w2, b2 = pp["w2"], pp["b2"]
    wh, bh = pp["wh"], pp["bh"]
    h1p, h2p = w1.shape[1], w2.shape[1]

    in_specs = [
        pl.BlockSpec((TB, state_dim), lambda i: (i, 0)),   # x: batch-tiled
        pl.BlockSpec(w1.shape, lambda i: (0, 0)),          # weights/biases: resident
        pl.BlockSpec(b1.shape, lambda i: (0, 0)),
        pl.BlockSpec(w2.shape, lambda i: (0, 0)),
        pl.BlockSpec(b2.shape, lambda i: (0, 0)),
        pl.BlockSpec(wh.shape, lambda i: (0, 0)),
        pl.BlockSpec(bh.shape, lambda i: (0, 0)),
    ]
    out_specs = pl.BlockSpec((TB, headp), lambda i: (i, 0))

    flops = 2 * B * (state_dim * h1p + h1p * h2p + h2p * headp)
    bytes_accessed = (x.size * 2                                  # bf16 activations in
                      + (w1.size + w2.size + wh.size) * 2         # bf16 weights
                      + (b1.size + b2.size + bh.size) * 4         # f32 biases
                      + B * headp * 2)                            # bf16 slab out
    cost = pl.CostEstimate(flops=flops, transcendentals=0,
                           bytes_accessed=bytes_accessed)

    y = pl.pallas_call(
        functools.partial(actor_kernel, A),
        out_shape=jax.ShapeDtypeStruct((B, headp), jnp.bfloat16),
        grid=grid,
        in_specs=in_specs,
        out_specs=out_specs,
        cost_estimate=cost,
        compiler_params=pltpu.CompilerParams(
            dimension_semantics=("parallel",)),
    )(x, w1, b1, w2, b2, wh, bh)

    # One contiguous slice of the packed slab, upcast once, then split.
    packed = y[:, :2 * A].astype(jnp.float32)
    mu = packed[:, :A]
    log_std = packed[:, A:]
    return mu, log_std


def actor_ref(x, p):
    """Pure-JAX f32 reference mirroring the PyTorch module."""
    h1 = jnp.maximum(x @ p["w1"] + p["b1"], 0.0)
    h2 = jnp.maximum(h1 @ p["w2"] + p["b2"], 0.0)
    mu = h2 @ p["wmu"] + p["bmu"]
    ls = jnp.clip(jnp.maximum(h2 @ p["wls"] + p["bls"], 0.0),
                  MIN_LOG_STD, MAX_LOG_STD)
    return mu, ls


if __name__ == "__main__":
    STATE_DIM = 16
    ACTION_DIM = 4

    key = jax.random.PRNGKey(0)
    kx, kx2, kp = jax.random.split(key, 3)
    params = init_params(kp, STATE_DIM, ACTION_DIM)
    packed = prepare_params(params, ACTION_DIM)

    # Small-batch path (single grid step).
    B = 2
    x = jax.random.normal(kx, (B, STATE_DIM), jnp.float32)
    mu, log_std = actor_forward(x, packed)
    jax.block_until_ready((mu, log_std))

    mu_ref, ls_ref = actor_ref(x, params)
    assert mu.shape == (B, ACTION_DIM) and log_std.shape == (B, ACTION_DIM)
    # bf16 MXU operands + bf16 output slab (f32 accumulation): bf16-level tolerance.
    assert jnp.allclose(mu, mu_ref, atol=3e-2, rtol=3e-2)
    assert jnp.allclose(log_std, ls_ref, atol=3e-2, rtol=3e-2)

    # Tiled path: 2 grid steps with a masked tail block (no jnp.pad), which is
    # also what lets both v7x TensorCores work on mid-size batches.
    B2 = 260
    x2 = jax.random.normal(kx2, (B2, STATE_DIM), jnp.float32)
    mu2, ls2 = actor_forward(x2, packed)
    jax.block_until_ready((mu2, ls2))
    mu2_ref, ls2_ref = actor_ref(x2, params)
    assert mu2.shape == (B2, ACTION_DIM) and ls2.shape == (B2, ACTION_DIM)
    assert jnp.allclose(mu2, mu2_ref, atol=3e-2, rtol=3e-2)
    assert jnp.allclose(ls2, ls2_ref, atol=3e-2, rtol=3e-2)

    print("KERNEL_OK")
</pallas_src>

<mosaic_0001>
module attributes {stable_mosaic.version = 11 : i64} {
  func.func @actor_kernel(%arg0: i32, %arg1: memref<2x16xbf16, #tpu.memory_space<vmem>>, %arg2: memref<16x512xbf16, #tpu.memory_space<vmem>>, %arg3: memref<1x512xf32, #tpu.memory_space<vmem>>, %arg4: memref<512x384xbf16, #tpu.memory_space<vmem>>, %arg5: memref<1x384xf32, #tpu.memory_space<vmem>>, %arg6: memref<384x128xbf16, #tpu.memory_space<vmem>>, %arg7: memref<1x128xf32, #tpu.memory_space<vmem>>, %arg8: memref<2x128xbf16, #tpu.memory_space<vmem>>) attributes {dimension_semantics = [#tpu.dimension_semantics<parallel>], iteration_bounds = array<i64: 1>, scalar_prefetch = 0 : i64, scratch_operands = 0 : i64, tpu.core_type = #tpu.core_type<tc>, window_params = [{transform_indices = @transform_0, window_bounds = array<i64: 2, 16>}, {pipeline_mode = #tpu.pipeline_mode<synchronous>, transform_indices = @transform_1, window_bounds = array<i64: 16, 512>}, {pipeline_mode = #tpu.pipeline_mode<synchronous>, transform_indices = @transform_2, window_bounds = array<i64: 1, 512>}, {pipeline_mode = #tpu.pipeline_mode<synchronous>, transform_indices = @transform_3, window_bounds = array<i64: 512, 384>}, {pipeline_mode = #tpu.pipeline_mode<synchronous>, transform_indices = @transform_4, window_bounds = array<i64: 1, 384>}, {pipeline_mode = #tpu.pipeline_mode<synchronous>, transform_indices = @transform_5, window_bounds = array<i64: 384, 128>}, {pipeline_mode = #tpu.pipeline_mode<synchronous>, transform_indices = @transform_6, window_bounds = array<i64: 1, 128>}, {transform_indices = @transform_7, window_bounds = array<i64: 2, 128>}]} {
    %c0 = arith.constant 0 : index
    %c0_0 = arith.constant 0 : index
    %0 = vector.load %arg1[%c0, %c0_0] : memref<2x16xbf16, #tpu.memory_space<vmem>>, vector<2x16xbf16>
    %c0_1 = arith.constant 0 : index
    %c0_2 = arith.constant 0 : index
    %1 = vector.load %arg2[%c0_1, %c0_2] : memref<16x512xbf16, #tpu.memory_space<vmem>>, vector<16x512xbf16>
    %cst = arith.constant dense<0.000000e+00> : vector<2x512xf32>
    %2 = tpu.matmul %0, %1, %cst {dimension_numbers = #tpu.dot_dimension_numbers<[1], [0], [0], [1], [0, 0, 1, 1], [], []>} : vector<2x16xbf16>, vector<16x512xbf16>, vector<2x512xf32> -> vector<2x512xf32>
    %c0_3 = arith.constant 0 : index
    %c0_4 = arith.constant 0 : index
    %3 = vector.load %arg3[%c0_3, %c0_4] : memref<1x512xf32, #tpu.memory_space<vmem>>, vector<1x512xf32>
    %4 = vector.broadcast %3 : vector<1x512xf32> to vector<2x512xf32>
    %5 = arith.addf %2, %4 : vector<2x512xf32>
    %cst_5 = arith.constant 0.000000e+00 : f32
    %6 = vector.broadcast %cst_5 : f32 to vector<2x512xf32>
    %7 = arith.maximumf %5, %6 : vector<2x512xf32>
    %8 = arith.truncf %7 : vector<2x512xf32> to vector<2x512xbf16>
    %c0_6 = arith.constant 0 : index
    %c0_7 = arith.constant 0 : index
    %9 = vector.load %arg4[%c0_6, %c0_7] : memref<512x384xbf16, #tpu.memory_space<vmem>>, vector<512x384xbf16>
    %cst_8 = arith.constant dense<0.000000e+00> : vector<2x384xf32>
    %10 = tpu.matmul %8, %9, %cst_8 {dimension_numbers = #tpu.dot_dimension_numbers<[1], [0], [0], [1], [0, 0, 1, 1], [], []>} : vector<2x512xbf16>, vector<512x384xbf16>, vector<2x384xf32> -> vector<2x384xf32>
    %c0_9 = arith.constant 0 : index
    %c0_10 = arith.constant 0 : index
    %11 = vector.load %arg5[%c0_9, %c0_10] : memref<1x384xf32, #tpu.memory_space<vmem>>, vector<1x384xf32>
    %12 = vector.broadcast %11 : vector<1x384xf32> to vector<2x384xf32>
    %13 = arith.addf %10, %12 : vector<2x384xf32>
    %cst_11 = arith.constant 0.000000e+00 : f32
    %14 = vector.broadcast %cst_11 : f32 to vector<2x384xf32>
    %15 = arith.maximumf %13, %14 : vector<2x384xf32>
    %16 = arith.truncf %15 : vector<2x384xf32> to vector<2x384xbf16>
    %c0_12 = arith.constant 0 : index
    %c0_13 = arith.constant 0 : index
    %17 = vector.load %arg6[%c0_12, %c0_13] : memref<384x128xbf16, #tpu.memory_space<vmem>>, vector<384x128xbf16>
    %cst_14 = arith.constant dense<0.000000e+00> : vector<2x128xf32>
    %18 = tpu.matmul %16, %17, %cst_14 {dimension_numbers = #tpu.dot_dimension_numbers<[1], [0], [0], [1], [0, 0, 1, 1], [], []>} : vector<2x384xbf16>, vector<384x128xbf16>, vector<2x128xf32> -> vector<2x128xf32>
    %c0_15 = arith.constant 0 : index
    %c0_16 = arith.constant 0 : index
    %19 = vector.load %arg7[%c0_15, %c0_16] : memref<1x128xf32, #tpu.memory_space<vmem>>, vector<1x128xf32>
    %20 = vector.broadcast %19 : vector<1x128xf32> to vector<2x128xf32>
    %21 = arith.addf %18, %20 : vector<2x128xf32>
    %22 = tpu.iota {dimensions = array<i32: 1>} : vector<1x128xi32>
    %c4_i32 = arith.constant 4 : i32
    %23 = vector.broadcast %c4_i32 : i32 to vector<1x128xi32>
    %24 = arith.cmpi sge, %22, %23 : vector<1x128xi32>
    %c8_i32 = arith.constant 8 : i32
    %25 = vector.broadcast %c8_i32 : i32 to vector<1x128xi32>
    %26 = arith.cmpi slt, %22, %25 : vector<1x128xi32>
    %27 = arith.andi %24, %26 : vector<1x128xi1>
    %cst_17 = arith.constant 0.000000e+00 : f32
    %cst_18 = arith.constant 2.000000e+00 : f32
    %28 = vector.broadcast %cst_17 : f32 to vector<2x128xf32>
    %29 = arith.maximumf %28, %21 : vector<2x128xf32>
    %30 = vector.broadcast %cst_18 : f32 to vector<2x128xf32>
    %31 = arith.minimumf %30, %29 : vector<2x128xf32>
    %32 = vector.shape_cast %27 : vector<1x128xi1> to vector<1x128xi1>
    %33 = vector.broadcast %32 : vector<1x128xi1> to vector<2x128xi1>
    %34 = arith.select %33, %31, %21 : vector<2x128xi1>, vector<2x128xf32>
    %35 = arith.truncf %34 : vector<2x128xf32> to vector<2x128xbf16>
    %c0_19 = arith.constant 0 : index
    %c0_20 = arith.constant 0 : index
    %36 = vector.load %arg8[%c0_19, %c0_20] : memref<2x128xbf16, #tpu.memory_space<vmem>>, vector<2x128xbf16>
    tpu.vector_store %arg8[%c0_19, %c0_20], %35 {strides = array<i32>} : memref<2x128xbf16, #tpu.memory_space<vmem>>, vector<2x128xbf16>,
    return
  }
  func.func @transform_0(%arg0: i32) -> (i32, i32) {
    %c0_i32 = arith.constant 0 : i32
    %c0_i32_0 = arith.constant 0 : i32
    return %arg0, %c0_i32 : i32, i32
  }
  func.func @transform_1(%arg0: i32) -> (i32, i32) {
    %c0_i32 = arith.constant 0 : i32
    %c0_i32_0 = arith.constant 0 : i32
    %c0_i32_1 = arith.constant 0 : i32
    return %c0_i32, %c0_i32_0 : i32, i32
  }
  func.func @transform_2(%arg0: i32) -> (i32, i32) {
    %c0_i32 = arith.constant 0 : i32
    %c0_i32_0 = arith.constant 0 : i32
    %c0_i32_1 = arith.constant 0 : i32
    return %c0_i32, %c0_i32_0 : i32, i32
  }
  func.func @transform_3(%arg0: i32) -> (i32, i32) {
    %c0_i32 = arith.constant 0 : i32
    %c0_i32_0 = arith.constant 0 : i32
    %c0_i32_1 = arith.constant 0 : i32
    return %c0_i32, %c0_i32_0 : i32, i32
  }
  func.func @transform_4(%arg0: i32) -> (i32, i32) {
    %c0_i32 = arith.constant 0 : i32
    %c0_i32_0 = arith.constant 0 : i32
    %c0_i32_1 = arith.constant 0 : i32
    return %c0_i32, %c0_i32_0 : i32, i32
  }
  func.func @transform_5(%arg0: i32) -> (i32, i32) {
    %c0_i32 = arith.constant 0 : i32
    %c0_i32_0 = arith.constant 0 : i32
    %c0_i32_1 = arith.constant 0 : i32
    return %c0_i32, %c0_i32_0 : i32, i32
  }
  func.func @transform_6(%arg0: i32) -> (i32, i32) {
    %c0_i32 = arith.constant 0 : i32
    %c0_i32_0 = arith.constant 0 : i32
    %c0_i32_1 = arith.constant 0 : i32
    return %c0_i32, %c0_i32_0 : i32, i32
  }
  func.func @transform_7(%arg0: i32) -> (i32, i32) {
    %c0_i32 = arith.constant 0 : i32
    %c0_i32_0 = arith.constant 0 : i32
    return %arg0, %c0_i32 : i32, i32
  }
}

</mosaic_0001>

<bundles_post_ra>
// kernel: tpu_custom_call.1
= control target key start
LH: loop header
LB: loop body
LE: loop exit
PB: predicated region body
PF: predicated region fallthrough
CT: control target
= control target key end

     0   :  { %12 = vsyncpa [#allocation3], 0  ;;  %s1996_s0 = inlined_call_operand.hbm [shape: bf16[2,16], index: 0, kind: input, shape index: {}]   ;;  %s1997_s1 = inlined_call_operand.hbm [shape: bf16[16,512], index: 1, kind: input, shape index: {}]   ;;  %s1998_s2 = inlined_call_operand.hbm [shape: f32[1,512], index: 2, kind: input, shape index: {}]   ;;  %s1999_s3 = inlined_call_operand.hbm [shape: bf16[512,384], index: 3, kind: input, shape index: {}]   ;;  %s2000_s4 = inlined_call_operand.vmem [shape: f32[1,384], index: 4, kind: input, shape index: {}]   ;;  %s2001_s5 = inlined_call_operand.hbm [shape: bf16[384,128], index: 5, kind: input, shape index: {}]   ;;  %s2002_s6 = inlined_call_operand.vmem [shape: f32[1,128], index: 6, kind: input, shape index: {}]   ;;  %s2003_s7 = inlined_call_operand.hbm [shape: bf16[2,128], index: 7, kind: output, shape index: {}]  }
   0x1   :  { %13 = vsyncpa [#allocation6], 0 }
   0x2   :  { %14 = vsyncpa [#allocation9], 0 }
   0x3   :  { %15 = vsyncpa [#allocation4], 0  ;;  %s1889_s24 = smov [#allocation5]  }
   0x4   :  { %s31_s25 = sshll.u32 %s1889_s24, 4  ;;  %s32_s25 = int_to_ptr.vmem [resolvable:$true] %s31_s25 }
   0x5   :  { %s1769_s26 = scalar_lea.vmem %s32_s25, 512  ;;  %p1774_p1 = scmp.lt.s32.totalorder %s32_s25, %s32_s25 }
   0x6   :  { %p1770_p0 = scmp.ne.s32.totalorder %s32_s25, %s1769_s26  ;;  %p1775_p2 = scmp.lt.s32.totalorder %s1769_s26, %s1769_s26 }
   0x8   :  { %p1776_p3 = por %p1775_p2, %p1774_p1 }
   0xa   :  { %p1777_p4 = pnand %p1776_p3, %p1770_p0 }
   0xc   :  { %1780 = shalt.err (!%p1777_p4)
}
   0xd   :  { %s1890_s27 = smov 256   ;;  %s1891_s28 = smov 16  }
   0xe   :  { %37 = dma.hbm_to_vmem [thread:$0]  %s1997_s1, 512, %s32_s25, [#allocation6], %s1890_s27, %s1890_s27, %s1891_s28  }
   0xf   :  { %s1892_s8 = smov [#allocation8]  }
  0x10   :  { %s53_s9 = sshll.u32 %s1892_s8, 4  ;;  %s54_s9 = int_to_ptr.vmem [resolvable:$true] %s53_s9 }
  0x11   :  { %s1789_s10 = scalar_lea.vmem %s54_s9, 12288  ;;  %p1794_p6 = scmp.lt.s32.totalorder %s54_s9, %s54_s9 }
  0x12   :  { %p1790_p5 = scmp.ne.s32.totalorder %s54_s9, %s1789_s10  ;;  %p1795_p7 = scmp.lt.s32.totalorder %s1789_s10, %s1789_s10 }
  0x14   :  { %p1796_p8 = por %p1795_p7, %p1794_p6 }
  0x16   :  { %p1797_p9 = pnand %p1796_p8, %p1790_p5 }
  0x18   :  { %1800 = shalt.err (!%p1797_p9)
}
  0x19   :  { %s1893_s11 = smov 192   ;;  %s1894_s12 = smov 12  }
  0x1a   :  { %59 = dma.hbm_to_vmem [thread:$0]  %s1999_s3, 12288, %s54_s9, [#allocation9], %s1893_s11, %s1893_s11, %s1894_s12  }
  0x1b   :  { %s1895_s15 = smov [#allocation2]   ;;  %s1896_s17 = smov [#allocation7]  }
  0x1c   :  { %s22_s16 = sshll.u32 %s1895_s15, 4  ;;  %s44_s1 = sshll.u32 %s1896_s17, 4  ;;  %s23_s16 = int_to_ptr.vmem [resolvable:$true] %s22_s16  ;;  %s45_s1 = int_to_ptr.vmem [resolvable:$true] %s44_s1 }
  0x1d   :  { %s1809_s18 = scalar_lea.vmem %s23_s16, 16  ;;  %s1813_s19 = scalar_lea.vmem %s23_s16, 32 }
  0x1e   :  { %p1810_p10 = scmp.ne.s32.totalorder %s23_s16, %s1809_s18  ;;  %p1814_p11 = scmp.lt.s32.totalorder %s23_s16, %s23_s16 }
  0x1f   :  { %p1815_p12 = scmp.lt.s32.totalorder %s1813_s19, %s1809_s18 }
  0x21   :  { %p1816_p13 = por %p1815_p12, %p1814_p11 }
  0x23   :  { %p1817_p0 = pnand %p1816_p13, %p1810_p10 }
  0x25   :  { %1820 = shalt.err (!%p1817_p0)
}
  0x26   :  { %25 = dma.hbm_to_vmem [thread:$0]  %s1996_s0, 16, %s23_s16, [#allocation3]  }
  0x27   :  { %s1829_s22 = scalar_lea.vmem %s45_s1, 64  ;;  %p1834_p2 = scmp.lt.s32.totalorder %s45_s1, %s45_s1 }
  0x28   :  { %p1830_p1 = scmp.ne.s32.totalorder %s45_s1, %s1829_s22  ;;  %p1835_p3 = scmp.lt.s32.totalorder %s1829_s22, %s1829_s22 }
  0x2a   :  { %p1836_p4 = por %p1835_p3, %p1834_p2 }
  0x2c   :  { %p1837_p5 = pnand %p1836_p4, %p1830_p1 }
  0x2e   :  { %1840 = shalt.err (!%p1837_p5)
}
  0x2f   :  { %47 = dma.hbm_to_vmem [thread:$0]  %s1998_s2, 64, %s45_s1, [#allocation6]  }
  0x30   :  { %s1897_s24 = smov [#allocation10]  }
  0x31   :  { %s67_s25 = sshll.u32 %s1897_s24, 4  ;;  %s68_s25 = int_to_ptr.vmem [resolvable:$true] %s67_s25 }
  0x32   :  { %s1849_s26 = scalar_lea.vmem %s68_s25, 3072  ;;  %p1854_p7 = scmp.lt.s32.totalorder %s68_s25, %s68_s25 }
  0x33   :  { %p1850_p6 = scmp.ne.s32.totalorder %s68_s25, %s1849_s26  ;;  %p1855_p8 = scmp.lt.s32.totalorder %s1849_s26, %s1849_s26 }
  0x35   :  { %p1856_p9 = por %p1855_p8, %p1854_p7 }
  0x37   :  { %p1857_p10 = pnand %p1856_p9, %p1850_p6 }
  0x39   :  { %1860 = shalt.err (!%p1857_p10)
}
  0x3a   :  { %s1898_s0 = smov 64   ;;  %s1899_s27 = smov 4  }
  0x3b   :  { %73 = dma.hbm_to_vmem [thread:$0]  %s2001_s5, 3072, %s68_s25, [#allocation9], %s1898_s0, %s1898_s0, %s1899_s27  }
  0x3c   :  { %1881 = dma.done.wait [#allocation3], 16  }
  0x3d   :  { %1882 = vsyncadd [#allocation3], 4294967280 }
  0x3e   :  { %1883 = dma.done.wait [#allocation6], 576  }
  0x3f   :  { %1884 = vsyncadd [#allocation6], 4294966720 }
  0x40   :  { %1885 = dma.done.wait [#allocation9], 15360  }
  0x41   :  { %1886 = vsyncadd [#allocation9], 4294951936  ;;  %v1900_v0 = vmov 0   ;;  %v1603_v1 = vld [vmem:[#allocation5 + $0x4] ss:$16 sps:$4 sm:$0xff]   ;;  %vm139_vm0 = vcmask 130048  }
  0x42   :  { %175 = vmatprep.mubr.bf16.mxu0 %v1900_v0  ;;  %216 = vmatprep.mubr.bf16.mxu1 %v1900_v0  ;;  %v1605_v2 = vld [vmem:[#allocation5 + $0xc] ss:$16 sps:$4 sm:$0xff]   ;;  %v1607_v3 = vld [vmem:[#allocation5] ss:$16 sps:$4 sm:$0xff]   ;;  %v1608_v4 = vld [vmem:[#allocation5 + $0x8] ss:$16 sps:$4 sm:$0xff]  }
  0x43   :  { %157 = vmatprep.subr.bf16.mxu0 %v1603_v1  ;;  %v92_v5 = vld [vmem:[#allocation2] sm:$0x1]  ;;  %198 = vmatprep.subr.bf16.mxu1 %v1605_v2  ;;  %v1609_v6 = vld [vmem:[#allocation8 + $0xa8] ss:$12 sps:$4 sm:$0xff]   ;;  %v1615_v11 = vld [vmem:[#allocation8 + $0x90] ss:$12 sps:$4 sm:$0xff]  }
  0x44   :  { %158 = vmatpush1.bf16.msra.mxu0 %v1607_v3  ;;  %199 = vmatpush1.bf16.msra.mxu1 %v1608_v4  ;;  %v1611_v7 = vld [vmem:[#allocation8 + $0xac] ss:$12 sps:$4 sm:$0xff]   ;;  %v1612_v8 = vld [vmem:[#allocation8 + $0x228] ss:$12 sps:$4 sm:$0xff]   ;;  %v1618_v13 = vld [vmem:[#allocation8 + $0x210] ss:$12 sps:$4 sm:$0xff]  }
  0x45   :  { %v1614_v9 = vld [vmem:[#allocation8 + $0x22c] ss:$12 sps:$4 sm:$0xff]   ;;  %890 = vmatprep.subr.bf16.mxu0 %v1611_v7  ;;  %v1617_v10 = vld [vmem:[#allocation8 + $0x94] ss:$12 sps:$4 sm:$0xff]   ;;  %v1623_v14 = vld [vmem:[#allocation8 + $0x7c] ss:$12 sps:$4 sm:$0xff]  }
  0x46   :  { %931 = vmatprep.subr.bf16.mxu1 %v1614_v9  ;;  %v1620_v12 = vld [vmem:[#allocation8 + $0x214] ss:$12 sps:$4 sm:$0xff]   ;;  %v1626_v15 = vld [vmem:[#allocation8 + $0x1fc] ss:$12 sps:$4 sm:$0xff]   ;;  %v1621_v16 = vld [vmem:[#allocation8 + $0x78] ss:$12 sps:$4 sm:$0xff]  }
  0x47   :  { %1370 = vmatmul.mubr.msk.bf16.vlgmr.msra.gmra.mxu0 %vm139_vm0, %v92_v5  ;;  %1371 = vmatmul.mubr.msk.bf16.vlgmr.msra.gmra.mxu1 %vm139_vm0, %v92_v5  ;;  %v1624_v17 = vld [vmem:[#allocation8 + $0x1f8] ss:$12 sps:$4 sm:$0xff]   ;;  %v1627_v20 = vld [vmem:[#allocation8 + $0x60] ss:$12 sps:$4 sm:$0xff]   ;;  %v1633_v24 = vld [vmem:[#allocation8 + $0x48] ss:$12 sps:$4 sm:$0xff]  }
  0x48   :  { %891 = vmatpush1.bf16.msra.mxu0 %v1609_v6  ;;  %932 = vmatpush1.bf16.msra.mxu1 %v1612_v8  ;;  %v1629_v18 = vld [vmem:[#allocation8 + $0x64] ss:$12 sps:$4 sm:$0xff]   ;;  %v1630_v21 = vld [vmem:[#allocation8 + $0x1e0] ss:$12 sps:$4 sm:$0xff]   ;;  %v1636_v25 = vld [vmem:[#allocation8 + $0x1c8] ss:$12 sps:$4 sm:$0xff]   ;;  %v99_v8 = vlaneseq }
  0x49   :  { %892 = vmatprep.subr.bf16.mxu0 %v1617_v10  ;;  %933 = vmatprep.subr.bf16.mxu1 %v1620_v12  ;;  %v1632_v19 = vld [vmem:[#allocation8 + $0x1e4] ss:$12 sps:$4 sm:$0xff]   ;;  %v1635_v22 = vld [vmem:[#allocation8 + $0x4c] ss:$12 sps:$4 sm:$0xff]   ;;  %v1641_v26 = vld [vmem:[#allocation8 + $0x34] ss:$12 sps:$4 sm:$0xff]  }
  0x4a   :  { %v1638_v23 = vld [vmem:[#allocation8 + $0x1cc] ss:$12 sps:$4 sm:$0xff]   ;;  %v1644_v27 = vld [vmem:[#allocation8 + $0x1b4] ss:$12 sps:$4 sm:$0xff]   ;;  %v1639_v28 = vld [vmem:[#allocation8 + $0x30] ss:$12 sps:$4 sm:$0xff]  }
  0x4b   :  { %v1642_v29 = vld [vmem:[#allocation8 + $0x1b0] ss:$12 sps:$4 sm:$0xff]   ;;  %v1645_v32 = vld [vmem:[#allocation8 + $0x18] ss:$12 sps:$4 sm:$0xff]   ;;  %v1651_v36 = vld [vmem:[#allocation8] ss:$12 sps:$4 sm:$0xff]  }
  0x4c   :  { %893 = vmatpush1.bf16.msra.mxu0 %v1615_v11  ;;  %934 = vmatpush1.bf16.msra.mxu1 %v1618_v13  ;;  %v1647_v30 = vld [vmem:[#allocation8 + $0x1c] ss:$12 sps:$4 sm:$0xff]   ;;  %v1648_v33 = vld [vmem:[#allocation8 + $0x198] ss:$12 sps:$4 sm:$0xff]   ;;  %v1654_v37 = vld [vmem:[#allocation8 + $0x180] ss:$12 sps:$4 sm:$0xff]  }
  0x4d   :  { %894 = vmatprep.subr.bf16.mxu0 %v1623_v14  ;;  %935 = vmatprep.subr.bf16.mxu1 %v1626_v15  ;;  %v1650_v31 = vld [vmem:[#allocation8 + $0x19c] ss:$12 sps:$4 sm:$0xff]   ;;  %v1653_v34 = vld [vmem:[#allocation8 + $0x4] ss:$12 sps:$4 sm:$0xff]   ;;  %v1659_v38 = vld [vmem:[#allocation8 + $0x16c] ss:$12 sps:$4 sm:$0xff]  }
  0x4e   :  { %v1656_v35 = vld [vmem:[#allocation8 + $0x184] ss:$12 sps:$4 sm:$0xff]   ;;  %v1662_v39 = vld [vmem:[#allocation8 + $0x2ec] ss:$12 sps:$4 sm:$0xff]   ;;  %v1657_v40 = vld [vmem:[#allocation8 + $0x168] ss:$12 sps:$4 sm:$0xff]  }
  0x4f   :  { %v1660_v41 = vld [vmem:[#allocation8 + $0x2e8] ss:$12 sps:$4 sm:$0xff]   ;;  %v1663_v43 = vld [vmem:[#allocation8 + $0x150] ss:$12 sps:$4 sm:$0xff]   ;;  %v1669_v48 = vld [vmem:[#allocation8 + $0x138] ss:$12 sps:$4 sm:$0xff]  }
  0x50   :  { %895 = vmatpush1.bf16.msra.mxu0 %v1621_v16  ;;  %936 = vmatpush1.bf16.msra.mxu1 %v1624_v17  ;;  %v1665_v42 = vld [vmem:[#allocation8 + $0x154] ss:$12 sps:$4 sm:$0xff]   ;;  %v1666_v45 = vld [vmem:[#allocation8 + $0x2d0] ss:$12 sps:$4 sm:$0xff]   ;;  %v1672_v49 = vld [vmem:[#allocation8 + $0x2b8] ss:$12 sps:$4 sm:$0xff]  }
  0x51   :  { %896 = vmatprep.subr.bf16.mxu0 %v1629_v18  ;;  %937 = vmatprep.subr.bf16.mxu1 %v1632_v19  ;;  %v1668_v44 = vld [vmem:[#allocation8 + $0x2d4] ss:$12 sps:$4 sm:$0xff]   ;;  %v1671_v46 = vld [vmem:[#allocation8 + $0x13c] ss:$12 sps:$4 sm:$0xff]   ;;  %v1677_v50 = vld [vmem:[#allocation8 + $0x124] ss:$12 sps:$4 sm:$0xff]  }
  0x52   :  { %v1674_v47 = vld [vmem:[#allocation8 + $0x2bc] ss:$12 sps:$4 sm:$0xff]   ;;  %v1680_v51 = vld [vmem:[#allocation8 + $0x2a4] ss:$12 sps:$4 sm:$0xff]   ;;  %v1675_v52 = vld [vmem:[#allocation8 + $0x120] ss:$12 sps:$4 sm:$0xff]  }
  0x53   :  { %v1678_v53 = vld [vmem:[#allocation8 + $0x2a0] ss:$12 sps:$4 sm:$0xff]   ;;  %v1681_v56 = vld [vmem:[#allocation8 + $0x108] ss:$12 sps:$4 sm:$0xff]   ;;  %v1687_v60 = vld [vmem:[#allocation8 + $0xf0] ss:$12 sps:$4 sm:$0xff]  }
  0x54   :  { %897 = vmatpush1.bf16.msra.mxu0 %v1627_v20  ;;  %938 = vmatpush1.bf16.msra.mxu1 %v1630_v21  ;;  %v1683_v54 = vld [vmem:[#allocation8 + $0x10c] ss:$12 sps:$4 sm:$0xff]   ;;  %v1684_v57 = vld [vmem:[#allocation8 + $0x288] ss:$12 sps:$4 sm:$0xff]   ;;  %v1690_v61 = vld [vmem:[#allocation8 + $0x270] ss:$12 sps:$4 sm:$0xff]  }
  0x55   :  { %898 = vmatprep.subr.bf16.mxu0 %v1635_v22  ;;  %939 = vmatprep.subr.bf16.mxu1 %v1638_v23  ;;  %v1686_v55 = vld [vmem:[#allocation8 + $0x28c] ss:$12 sps:$4 sm:$0xff]   ;;  %v1689_v58 = vld [vmem:[#allocation8 + $0xf4] ss:$12 sps:$4 sm:$0xff]   ;;  %v1695_v62 = vld [vmem:[#allocation8 + $0xdc] ss:$12 sps:$4 sm:$0xff]  }
  0x56   :  { %v1692_v59 = vld [vmem:[#allocation8 + $0x274] ss:$12 sps:$4 sm:$0xff]   ;;  %v1698_v63 = vld [vmem:[#allocation8 + $0x25c] ss:$12 sps:$4 sm:$0xff]   ;;  %v1693_v0 = vld [vmem:[#allocation8 + $0xd8] ss:$12 sps:$4 sm:$0xff]  }
  0x57   :  { %v1696_v1 = vld [vmem:[#allocation8 + $0x258] ss:$12 sps:$4 sm:$0xff]   ;;  %v1699_v4 = vld [vmem:[#allocation8 + $0xc0] ss:$12 sps:$4 sm:$0xff]   ;;  %v1705_v6 = vld [vmem:[#allocation8 + $0x170] ss:$12 sps:$4 sm:$0xff]  }
  0x58   :  { %899 = vmatpush1.bf16.msra.mxu0 %v1633_v24  ;;  %940 = vmatpush1.bf16.msra.mxu1 %v1636_v25  ;;  %v1701_v2 = vld [vmem:[#allocation8 + $0xc4] ss:$12 sps:$4 sm:$0xff]   ;;  %v1702_v5 = vld [vmem:[#allocation8 + $0x240] ss:$12 sps:$4 sm:$0xff]   ;;  %v1960_v9 = vshrl.u32 %v99_v8, 7  ;;  %vm1902_vm1 = vmmov 0  }
  0x59   :  { %900 = vmatprep.subr.bf16.mxu0 %v1641_v26  ;;  %941 = vmatprep.subr.bf16.mxu1 %v1644_v27  ;;  %v1704_v3 = vld [vmem:[#allocation8 + $0x244] ss:$12 sps:$4 sm:$0xff]   ;;  %v97_v12 = vld [vmem:[#allocation7] sm:$0xf]  ;;  %s1903_s8 = smov [#allocation11]  }
  0x5a   :  { %v1706_v7 = vld [vmem:[#allocation8 + $0x2f0] ss:$12 sps:$4 sm:$0xff]   ;;  %v101_v10 = vsub.s32 0, %v1960_v9  ;;  %v109_v11 = vsub.s32 2, %v1960_v9  ;;  %v105_v13 = vsub.s32 1, %v1960_v9  ;;  %v113_v14 = vsub.s32 3, %v1960_v9 }
  0x5b   :  { %v1468_v9 = vld [vmem:[%s2002_s6] ss:$0 sm:$0xff]  ;;  %s1355_s9 = sshll.u32 %s1903_s8, 4  ;;  %s1356_s9 = int_to_ptr.vmem [resolvable:$true] %s1355_s9 }
  0x5c   :  { %901 = vmatpush1.bf16.msra.mxu0 %v1639_v28  ;;  %942 = vmatpush1.bf16.msra.mxu1 %v1642_v29  ;;  %v102_v15 = vrot.slane %v97_v12, %v101_v10  ;;  %v110_v16 = vrot.slane %v97_v12, %v109_v11  ;;  %v106_v17 = vrot.slane %v97_v12, %v105_v13  ;;  %s1861_s6 = scalar_lea.vmem %s1356_s9, 16  ;;  %s1865_s10 = scalar_lea.vmem %s1356_s9, 32 }
  0x5d   :  { %902 = vmatprep.subr.bf16.mxu0 %v1647_v30  ;;  %943 = vmatprep.subr.bf16.mxu1 %v1650_v31  ;;  %v114_v18 = vrot.slane %v97_v12, %v113_v14  ;;  %v1740_v12 = vld [vmem:[#allocation10 + $0x30] sm:$0xff]   ;;  %v1741_v14 = vld [vmem:[#allocation10 + $0x68] sm:$0xff]   ;;  %p1862_p11 = scmp.ne.s32.totalorder %s1356_s9, %s1861_s6  ;;  %p1866_p12 = scmp.lt.s32.totalorder %s1356_s9, %s1356_s9 }
  0x5e   :  { %p1867_p13 = scmp.lt.s32.totalorder %s1865_s10, %s1861_s6 }
  0x60   :  { %903 = vmatpush1.bf16.msra.mxu0 %v1645_v32  ;;  %944 = vmatpush1.bf16.msra.mxu1 %v1648_v33  ;;  %p1868_p0 = por %p1867_p13, %p1866_p12 }
  0x61   :  { %904 = vmatprep.subr.bf16.mxu0 %v1653_v34  ;;  %945 = vmatprep.subr.bf16.mxu1 %v1656_v35 }
  0x62   :  { %p1869_p1 = pnand %p1868_p0, %p1862_p11 }
  0x64   :  { %905 = vmatpush1.bf16.msra.mxu0 %v1651_v36  ;;  %946 = vmatpush1.bf16.msra.mxu1 %v1654_v37 }
  0x65   :  { %906 = vmatprep.subr.bf16.mxu0 %v1659_v38  ;;  %947 = vmatprep.subr.bf16.mxu1 %v1662_v39  ;;  %v1707_v38 = vld [vmem:[#allocation8 + $0xb0] ss:$12 sps:$4 sm:$0xff]  }
  0x66   :  { %v1708_v39 = vld [vmem:[#allocation8 + $0x230] ss:$12 sps:$4 sm:$0xff]  }
  0x68   :  { %907 = vmatpush2.bf16.msra.mxu0 %v1657_v40  ;;  %948 = vmatpush2.bf16.msra.mxu1 %v1660_v41  ;;  %v1709_v41 = vld [vmem:[#allocation8 + $0x158] ss:$12 sps:$4 sm:$0xff]  }
  0x69   :  { %908 = vmatprep.subr.bf16.mxu0 %v1665_v42  ;;  %949 = vmatprep.subr.bf16.mxu1 %v1668_v44  ;;  %v1710_v42 = vld [vmem:[#allocation8 + $0x2d8] ss:$12 sps:$4 sm:$0xff]  }
  0x6a   :  { %v1712_v44 = vld [vmem:[#allocation8 + $0x218] ss:$12 sps:$4 sm:$0xff]  }
  0x6c   :  { %909 = vmatpush2.bf16.msra.mxu0 %v1663_v43  ;;  %950 = vmatpush2.bf16.msra.mxu1 %v1666_v45  ;;  %v1711_v43 = vld [vmem:[#allocation8 + $0x98] ss:$12 sps:$4 sm:$0xff]   ;;  %v1713_v45 = vld [vmem:[#allocation8 + $0x140] ss:$12 sps:$4 sm:$0xff]  }
  0x6d   :  { %910 = vmatprep.subr.bf16.mxu0 %v1671_v46  ;;  %951 = vmatprep.subr.bf16.mxu1 %v1674_v47  ;;  %v1714_v46 = vld [vmem:[#allocation8 + $0x2c0] ss:$12 sps:$4 sm:$0xff]  }
  0x6e   :  { %v1715_v47 = vld [vmem:[#allocation8 + $0x80] ss:$12 sps:$4 sm:$0xff]  }
  0x70   :  { %911 = vmatpush2.bf16.msra.mxu0 %v1669_v48  ;;  %952 = vmatpush2.bf16.msra.mxu1 %v1672_v49  ;;  %v1716_v48 = vld [vmem:[#allocation8 + $0x200] ss:$12 sps:$4 sm:$0xff]   ;;  %v1717_v49 = vld [vmem:[#allocation8 + $0x128] ss:$12 sps:$4 sm:$0xff]  }
  0x71   :  { %912 = vmatprep.subr.bf16.mxu0 %v1677_v50  ;;  %953 = vmatprep.subr.bf16.mxu1 %v1680_v51  ;;  %v1718_v50 = vld [vmem:[#allocation8 + $0x2a8] ss:$12 sps:$4 sm:$0xff]  }
  0x72   :  { %v1719_v51 = vld [vmem:[#allocation8 + $0x68] ss:$12 sps:$4 sm:$0xff]  }
  0x74   :  { %913 = vmatpush2.bf16.msra.mxu0 %v1675_v52  ;;  %954 = vmatpush2.bf16.msra.mxu1 %v1678_v53  ;;  %v1720_v52 = vld [vmem:[#allocation8 + $0x1e8] ss:$12 sps:$4 sm:$0xff]   ;;  %v1721_v53 = vld [vmem:[#allocation8 + $0x110] ss:$12 sps:$4 sm:$0xff]  }
  0x75   :  { %914 = vmatprep.subr.bf16.mxu0 %v1683_v54  ;;  %955 = vmatprep.subr.bf16.mxu1 %v1686_v55  ;;  %v1722_v54 = vld [vmem:[#allocation8 + $0x290] ss:$12 sps:$4 sm:$0xff]  }
  0x76   :  { %v1723_v55 = vld [vmem:[#allocation8 + $0x50] ss:$12 sps:$4 sm:$0xff]  }
  0x78   :  { %915 = vmatpush2.bf16.msra.mxu0 %v1681_v56  ;;  %956 = vmatpush2.bf16.msra.mxu1 %v1684_v57  ;;  %v1724_v56 = vld [vmem:[#allocation8 + $0x1d0] ss:$12 sps:$4 sm:$0xff]   ;;  %v1725_v57 = vld [vmem:[#allocation8 + $0xf8] ss:$12 sps:$4 sm:$0xff]  }
  0x79   :  { %916 = vmatprep.subr.bf16.mxu0 %v1689_v58  ;;  %957 = vmatprep.subr.bf16.mxu1 %v1692_v59  ;;  %v1726_v58 = vld [vmem:[#allocation8 + $0x278] ss:$12 sps:$4 sm:$0xff]  }
  0x7a   :  { %v1727_v59 = vld [vmem:[#allocation8 + $0x38] ss:$12 sps:$4 sm:$0xff]  }
  0x7c   :  { %917 = vmatpush2.bf16.msra.mxu0 %v1687_v60  ;;  %958 = vmatpush2.bf16.msra.mxu1 %v1690_v61  ;;  %v1728_v60 = vld [vmem:[#allocation8 + $0x1b8] ss:$12 sps:$4 sm:$0xff]   ;;  %v1729_v61 = vld [vmem:[#allocation8 + $0xe0] ss:$12 sps:$4 sm:$0xff]  }
  0x7d   :  { %918 = vmatprep.subr.bf16.mxu0 %v1695_v62  ;;  %959 = vmatprep.subr.bf16.mxu1 %v1698_v63  ;;  %v1730_v62 = vld [vmem:[#allocation8 + $0x260] ss:$12 sps:$4 sm:$0xff]  }
  0x7e   :  { %v1731_v63 = vld [vmem:[#allocation8 + $0x20] ss:$12 sps:$4 sm:$0xff]  }
  0x80   :  { %919 = vmatpush2.bf16.msra.mxu0 %v1693_v0  ;;  %960 = vmatpush2.bf16.msra.mxu1 %v1696_v1  ;;  %v1732_v0 = vld [vmem:[#allocation8 + $0x1a0] ss:$12 sps:$4 sm:$0xff]   ;;  %v1733_v1 = vld [vmem:[#allocation8 + $0xc8] ss:$12 sps:$4 sm:$0xff]  }
  0x81   :  { %920 = vmatprep.subr.bf16.mxu0 %v1701_v2  ;;  %961 = vmatprep.subr.bf16.mxu1 %v1704_v3  ;;  %v1734_v2 = vld [vmem:[#allocation8 + $0x248] ss:$12 sps:$4 sm:$0xff]  }
  0x82   :  { %v1735_v3 = vld [vmem:[#allocation8 + $0x8] ss:$12 sps:$4 sm:$0xff]  }
  0x84   :  { %921 = vmatpush2.bf16.msra.mxu0 %v1699_v4  ;;  %962 = vmatpush2.bf16.msra.mxu1 %v1702_v5  ;;  %v1736_v4 = vld [vmem:[#allocation8 + $0x188] ss:$12 sps:$4 sm:$0xff]   ;;  %v1737_v5 = vld [vmem:[#allocation10 + $0x78] sm:$0xff]  }
  0x85   :  { %1493 = vmatprep.subr.bf16.mxu0 %v1705_v6  ;;  %1515 = vmatprep.subr.bf16.mxu1 %v1706_v7  ;;  %v1738_v6 = vld [vmem:[#allocation10 + $0x38] sm:$0xff]   ;;  %v1739_v7 = vld [vmem:[#allocation10 + $0x70] sm:$0xff]  }
 0x107   :  { %v177_v19 = vpop.f32.mrf.mxu0  ;;  %v218_v20 = vpop.f32.mrf.mxu1 }
 0x108   :  { %v178_v21 = vadd.f32 %v177_v19, %v102_v15  ;;  %v219_v22 = vadd.f32 %v218_v20, %v110_v16  ;;  %v1742_v15 = vld [vmem:[#allocation10 + $0x28] sm:$0xff]   ;;  %v1743_v16 = vld [vmem:[#allocation10 + $0x60] sm:$0xff]   ;;  %v1746_v19 = vld [vmem:[#allocation10 + $0x18] sm:$0xff]  }
 0x109   :  { %v179_v23 = vpop.f32.mrf.mxu0  ;;  %v220_v24 = vpop.f32.mrf.mxu1  ;;  %v1747_v20 = vld [vmem:[#allocation10 + $0x50] sm:$0xff]  }
 0x10a   :  { %v227_v25 = vmax.f32 %v219_v22, 0.0  ;;  %v180_v26 = vadd.f32 %v179_v23, %v106_v17  ;;  %v221_v27 = vadd.f32 %v220_v24, %v114_v18  ;;  %v225_v28 = vmax.f32 %v178_v21, 0.0  ;;  %v1744_v17 = vld [vmem:[#allocation10 + $0x20] sm:$0xff]   ;;  %v1745_v18 = vld [vmem:[#allocation10 + $0x58] sm:$0xff]   ;;  %v1748_v21 = vld [vmem:[#allocation10 + $0x10] sm:$0xff]  }
 0x10b   :  { %v181_v29 = vpop.f32.mrf.mxu0  ;;  %v222_v30 = vpop.f32.mrf.mxu1  ;;  %v1749_v22 = vld [vmem:[#allocation10 + $0x48] sm:$0xff]   ;;  %v1751_v24 = vld [vmem:[#allocation10 + $0x40] sm:$0xff]  }
 0x10c   :  { %v226_v31 = vmax.f32 %v180_v26, 0.0  ;;  %v228_v32 = vmax.f32 %v221_v27, 0.0  ;;  %v1972_v33 = vpack.c.bf16 %v227_v25, %v227_v25  ;;  %v1974_v40 = vpack.c.bf16 %v225_v28, %v225_v28  ;;  %v1750_v23 = vld [vmem:[#allocation10 + $0x8] sm:$0xff]   ;;  %v1752_v25 = vld [vmem:[#allocation10] sm:$0xff]   ;;  %v1753_v26 = vld [vmem:[#allocation10 + $0xb8] sm:$0xff]  }
 0x10d   :  { %v182_v34 = vpop.f32.mrf.mxu0  ;;  %v223_v35 = vpop.f32.mrf.mxu1  ;;  %v1901_v27 = vmov 0.0   ;;  %v1754_v28 = vld [vmem:[#allocation10 + $0xb0] sm:$0xff]   ;;  %v1755_v29 = vld [vmem:[#allocation10 + $0xa8] sm:$0xff]   ;;  %v1756_v30 = vld [vmem:[#allocation10 + $0xa0] sm:$0xff]  }
 0x10e   :  { %v230_v36 = vpack.c.bf16 %v226_v31, %v226_v31  ;;  %v232_v37 = vpack.c.bf16 %v228_v32, %v228_v32  ;;  %v1757_v31 = vld [vmem:[#allocation10 + $0x98] sm:$0xff]   ;;  %v1758_v32 = vld [vmem:[#allocation10 + $0x90] sm:$0xff]   ;;  %v1760_v34 = vld [vmem:[#allocation10 + $0x80] sm:$0xff]  }
 0x10f   :  { %v361_v35 = vld [vmem:[%s2000_s4] sm:$0x7] }
 0x110   :  { %922 = vmatprep.mubr.bf16.mxu0 %v230_v36  ;;  %963 = vmatprep.mubr.bf16.mxu1 %v232_v37 }
 0x111   :  { %923 = vmatmul.mubr.bf16.vlgmr.msra.gmra.mxu0 %v1974_v40  ;;  %964 = vmatmul.mubr.bf16.vlgmr.msra.gmra.mxu1 %v1972_v33 }
 0x112   :  { %1494 = vmatpush3.bf16.msra.mxu0 %v1707_v38  ;;  %1516 = vmatpush3.bf16.msra.mxu1 %v1708_v39 }
 0x113   :  { %1004 = vmatprep.mubr.bf16.mxu0 %v230_v36  ;;  %1044 = vmatprep.mubr.bf16.mxu1 %v232_v37  ;;  %v366_v36 = vrot.slane %v361_v35, %v101_v10  ;;  %v370_v37 = vrot.slane %v361_v35, %v105_v13 }
 0x114   :  { %1495 = vmatprep.subr.bf16.mxu0 %v1709_v41  ;;  %1517 = vmatprep.subr.bf16.mxu1 %v1710_v42 }
 0x116   :  { %1496 = vmatpush3.bf16.msra.mxu0 %v1711_v43  ;;  %1518 = vmatpush3.bf16.msra.mxu1 %v1712_v44 }
 0x117   :  { %1497 = vmatprep.subr.bf16.mxu0 %v1713_v45  ;;  %1519 = vmatprep.subr.bf16.mxu1 %v1714_v46 }
 0x11a   :  { %1498 = vmatpush3.bf16.msra.mxu0 %v1715_v47  ;;  %1520 = vmatpush3.bf16.msra.mxu1 %v1716_v48 }
 0x11b   :  { %1499 = vmatprep.subr.bf16.mxu0 %v1717_v49  ;;  %1521 = vmatprep.subr.bf16.mxu1 %v1718_v50 }
 0x11e   :  { %1500 = vmatpush3.bf16.msra.mxu0 %v1719_v51  ;;  %1522 = vmatpush3.bf16.msra.mxu1 %v1720_v52 }
 0x11f   :  { %1501 = vmatprep.subr.bf16.mxu0 %v1721_v53  ;;  %1523 = vmatprep.subr.bf16.mxu1 %v1722_v54  ;;  %v374_v54 = vrot.slane %v361_v35, %v109_v11  ;;  %v1338_v11 = vand.u32 127, %v99_v8 }
 0x121   :  { %vm1339_vm2 = vcmp.ge.s32.totalorder %v1338_v11, 4  ;;  %vm1340_vm3 = vcmp.lt.s32.totalorder %v1338_v11, 8 }
 0x122   :  { %1502 = vmatpush3.bf16.msra.mxu0 %v1723_v55  ;;  %1524 = vmatpush3.bf16.msra.mxu1 %v1724_v56  ;;  %vm1341_vm4 = vmand %vm1339_vm2, %vm1340_vm3 }
 0x123   :  { %1503 = vmatprep.subr.bf16.mxu0 %v1725_v57  ;;  %1525 = vmatprep.subr.bf16.mxu1 %v1726_v58 }
 0x126   :  { %1504 = vmatpush3.bf16.msra.mxu0 %v1727_v59  ;;  %1526 = vmatpush3.bf16.msra.mxu1 %v1728_v60 }
 0x127   :  { %1505 = vmatprep.subr.bf16.mxu0 %v1729_v61  ;;  %1527 = vmatprep.subr.bf16.mxu1 %v1730_v62 }
 0x12a   :  { %1506 = vmatpush3.bf16.msra.mxu0 %v1731_v63  ;;  %1528 = vmatpush3.bf16.msra.mxu1 %v1732_v0 }
 0x12b   :  { %1507 = vmatprep.subr.bf16.mxu0 %v1733_v1  ;;  %1529 = vmatprep.subr.bf16.mxu1 %v1734_v2 }
 0x12e   :  { %1508 = vmatpush3.bf16.msra.mxu0 %v1735_v3  ;;  %1530 = vmatpush3.bf16.msra.mxu1 %v1736_v4 }
 0x12f   :  { %1537 = vmatprep.subr.bf16.mxu0 %v1737_v5  ;;  %1568 = vmatprep.subr.bf16.mxu1 %v1901_v27 }
 0x131   :  { %1005 = vmatmul.mubr.bf16.vlgmr.msra.gmra.mxu0 %v1974_v40  ;;  %1045 = vmatmul.mubr.bf16.vlgmr.msra.gmra.mxu1 %v1972_v33  ;;  %v1759_v33 = vld [vmem:[#allocation10 + $0x88] sm:$0xff]  }
 0x132   :  { %1538 = vmatpush3.bf16.msra.mxu0 %v1738_v6  ;;  %1569 = vmatpush3.bf16.msra.mxu1 %v1753_v26 }
 0x133   :  { %1539 = vmatprep.subr.bf16.mxu0 %v1739_v7  ;;  %1570 = vmatprep.subr.bf16.mxu1 %v1901_v27 }
 0x134   :  { %1584 = vmatprep.mubr.msk.bf16.mxu1 %vm1902_vm1, %v1901_v27 }
 0x136   :  { %1540 = vmatpush3.bf16.msra.mxu0 %v1740_v12  ;;  %1571 = vmatpush3.bf16.msra.mxu1 %v1754_v28 }
 0x137   :  { %1541 = vmatprep.subr.bf16.mxu0 %v1741_v14  ;;  %1572 = vmatprep.subr.bf16.mxu1 %v1901_v27 }
 0x13a   :  { %1542 = vmatpush3.bf16.msra.mxu0 %v1742_v15  ;;  %1573 = vmatpush3.bf16.msra.mxu1 %v1755_v29 }
 0x13b   :  { %1543 = vmatprep.subr.bf16.mxu0 %v1743_v16  ;;  %1574 = vmatprep.subr.bf16.mxu1 %v1901_v27 }
 0x13e   :  { %1544 = vmatpush3.bf16.msra.mxu0 %v1744_v17  ;;  %1575 = vmatpush3.bf16.msra.mxu1 %v1756_v30 }
 0x13f   :  { %1545 = vmatprep.subr.bf16.mxu0 %v1745_v18  ;;  %1576 = vmatprep.subr.bf16.mxu1 %v1901_v27 }
 0x142   :  { %1546 = vmatpush3.bf16.msra.mxu0 %v1746_v19  ;;  %1577 = vmatpush3.bf16.msra.mxu1 %v1757_v31 }
 0x143   :  { %1547 = vmatprep.subr.bf16.mxu0 %v1747_v20  ;;  %1578 = vmatprep.subr.bf16.mxu1 %v1901_v27 }
 0x146   :  { %1548 = vmatpush3.bf16.msra.mxu0 %v1748_v21  ;;  %1579 = vmatpush3.bf16.msra.mxu1 %v1758_v32 }
 0x147   :  { %1549 = vmatprep.subr.bf16.mxu0 %v1749_v22  ;;  %1580 = vmatprep.subr.bf16.mxu1 %v1901_v27 }
 0x14a   :  { %1550 = vmatpush3.bf16.msra.mxu0 %v1750_v23  ;;  %1581 = vmatpush3.bf16.msra.mxu1 %v1759_v33 }
 0x14b   :  { %1551 = vmatprep.subr.bf16.mxu0 %v1751_v24  ;;  %1582 = vmatprep.subr.bf16.mxu1 %v1901_v27 }
 0x14e   :  { %1552 = vmatpush3.bf16.msra.mxu0 %v1752_v25  ;;  %1583 = vmatpush3.bf16.msra.mxu1 %v1760_v34 }
 0x1d1   :  { %v924_v38 = vpop.f32.mrf.mxu0  ;;  %v965_v39 = vpop.f32.mrf.mxu1 }
 0x1d2   :  { %v925_v40 = vadd.f32 %v924_v38, %v366_v36 }
 0x1d3   :  { %v926_v41 = vpop.f32.mrf.mxu0  ;;  %v967_v42 = vpop.f32.mrf.mxu1 }
 0x1d4   :  { %v966_v43 = vadd.f32 %v965_v39, %v925_v40  ;;  %v927_v44 = vadd.f32 %v926_v41, %v370_v37 }
 0x1d5   :  { %v928_v45 = vpop.f32.mrf.mxu0  ;;  %v969_v46 = vpop.f32.mrf.mxu1 }
 0x1d6   :  { %v968_v47 = vadd.f32 %v967_v42, %v927_v44  ;;  %v1052_v48 = vmax.f32 %v966_v43, 0.0 }
 0x1d7   :  { %v929_v49 = vpop.f32.mrf.mxu0  ;;  %v970_v50 = vpop.f32.mrf.mxu1 }
 0x1d8   :  { %v1053_v51 = vmax.f32 %v968_v47, 0.0  ;;  %v1055_v53 = vpack.c.bf16 %v1052_v48, %v1052_v48 }
 0x1da   :  { %v1056_v52 = vpack.c.bf16 %v1053_v51, %v1053_v51 }
 0x1dc   :  { %1289 = vmatprep.mubr.bf16.mxu0 %v1056_v52 }
 0x1dd   :  { %1290 = vmatmul.mubr.bf16.vlgmr.msra.gmra.mxu0 %v1055_v53 }
 0x1f1   :  { %v1509_v10 = vpop.f32.mrf.mxu0  ;;  %v1531_v13 = vpop.f32.mrf.mxu1 }
 0x1f3   :  { %v1510_v55 = vpop.f32.mrf.mxu0  ;;  %v1532_v56 = vpop.f32.mrf.mxu1 }
 0x1f4   :  { %v1511_v57 = vadd.f32 %v1510_v55, %v1509_v10  ;;  %v1533_v61 = vadd.f32 %v1532_v56, %v1531_v13 }
 0x1f5   :  { %v1512_v58 = vpop.f32.mrf.mxu0  ;;  %v1534_v59 = vpop.f32.mrf.mxu1 }
 0x1f6   :  { %v1007_v60 = vadd.f32 %v1511_v57, %v374_v54 }
 0x1f7   :  { %v1513_v62 = vpop.f32.mrf.mxu0  ;;  %v1535_v63 = vpop.f32.mrf.mxu1 }
 0x1f8   :  { %v1047_v0 = vadd.f32 %v1533_v61, %v1007_v60 }
 0x1fa   :  { %v1054_v1 = vmax.f32 %v1047_v0, 0.0 }
 0x1fc   :  { %v1057_v2 = vpack.c.bf16 %v1054_v1, %v1054_v1 }
 0x1fe   :  { %1585 = vmatmul.mubr.bf16.vlgmr.msra.gmra.mxu1 %v1057_v2 }
 0x29d   :  { %v1553_v3 = vpop.f32.mrf.mxu0 }
 0x29f   :  { %v1554_v4 = vpop.f32.mrf.mxu0 }
 0x2a0   :  { %v1555_v7 = vadd.f32 %v1554_v4, %v1553_v3 }
 0x2a1   :  { %v1556_v5 = vpop.f32.mrf.mxu0 }
 0x2a2   :  { %v1292_v12 = vadd.f32 %v1555_v7, %v1468_v9 }
 0x2a3   :  { %v1557_v6 = vpop.f32.mrf.mxu0 }
 0x2be   :  { %v1331_v14 = vpop.f32.mrf.mxu1 }
 0x2bf   :  { %v1332_v15 = vadd.f32 %v1331_v14, %v1292_v12 }
 0x2c0   :  { %v1586_v16 = vpop.f32.mrf.mxu1 }
 0x2c1   :  { %v1342_v17 = vmax.f32 %v1332_v15, 0.0 }
 0x2c2   :  { %v1334_v18 = vpop.f32.mrf.mxu1 }
 0x2c3   :  { %v1343_v19 = vmin.f32 %v1342_v17, 2.0 }
 0x2c4   :  { %v1587_v20 = vpop.f32.mrf.mxu1 }
 0x2c5   :  { %v1346_v21 = vsel %vm1341_vm4, %v1343_v19, %v1332_v15 }
 0x2c6   :  { %v1347_v22 = vpack.c.bf16 %v1346_v21, %v1346_v21 }
 0x2c8   :  { %1348 = vst [vmem:[#allocation11] sm:$0x1] %v1347_v22 }
 0x2c9   :  { %1872 = shalt.err (!%p1869_p1)
}
 0x2ca   :  { %1358 = dma.vmem_to_hbm [thread:$0]  %s1356_s9, 16, %s2003_s7, [#allocation4]  }
 0x2cb   :  { %1887 = dma.done.wait [#allocation4], 16  }
 0x2cc   :  { %1888 = vsyncadd [#allocation4], 4294967280 }
 0x2cd   :  { %1362 = vsyncpa [#allocation3], 1 }
 0x2ce   :  { %1363 = vsyncpa [#allocation6], 1 }
 0x2cf   :  { %1364 = vsyncpa [#allocation9], 1 }
 0x2d0   :  { %1365 = vsyncpa [#allocation4], 1 }

</bundles_post_ra>
